<compile_context>
chip_gen: v6e
topology: v6e:2x2x1
jax: 0.10.0
libtpu: 0.0.40
codegen_flags: <defaults>
</compile_context>

<pallas_src>
import functools

import jax
import jax.numpy as jnp
from jax import lax
from jax.experimental import pallas as pl
from jax.experimental.pallas import tpu as pltpu

BN_EPS = 0.8          # BatchNorm1d(out_d, 0.8) -> eps = 0.8 (positional arg)
LEAKY_SLOPE = 0.2


def _make_kernel(num_hidden_layers: int):
    """Fused MLP kernel for a fixed number of hidden blocks (BN pre-folded)."""

    def kernel(x_ref, *refs):
        o_ref = refs[-1]
        p = refs[:-1]

        # x arrives in f32; the bf16 cast for the MXU happens in-kernel (cheap
        # VPU pack hidden under the matmul) rather than as a separate XLA pass.
        h = x_ref[...].astype(jnp.float32)
        i = 0
        for _ in range(num_hidden_layers):
            w, b = p[i][...], p[i + 1][...]       # W' bf16 (dim,out), b' f32 (1,out)
            i += 2
            z = jnp.dot(h.astype(jnp.bfloat16), w,
                        preferred_element_type=jnp.float32) + b
            # LeakyReLU(0.2): single VPU max (no compare+select).
            h = jnp.maximum(z, LEAKY_SLOPE * z)
            # Dropout(p=0.2) is identity in eval mode.

        # Final Linear(dim, 2) off the MXU: two lane-broadcast multiplies +
        # cross-lane (XLU) sums; both units have slack in this kernel.
        w_out = p[i][...]          # (2, dim) f32 (pre-transposed in the wrapper)
        b_out = p[i + 1][...]      # (1, 2) f32
        mu = jnp.sum(h * w_out[0:1, :], axis=-1, keepdims=True) + b_out[:, 0:1]
        sg = jnp.sum(h * w_out[1:2, :], axis=-1, keepdims=True) + b_out[:, 1:2]
        sg = jnp.maximum(sg, 0.0)                 # outlayer(): relu on sigma only

        # Assemble the (tb, 2) tile: col 0 = mu, col 1 = relu(sigma).
        col = lax.broadcasted_iota(jnp.int32, o_ref.shape, 1)
        o_ref[...] = jnp.where(col == 0, mu, sg)

    return kernel


def fold_bn_params(raw_params, num_hidden_layers):
    """Fold eval-mode BatchNorm into each Linear.

    raw_params layout per hidden layer: [W(in,out), b(1,out), gamma, beta,
    running_mean, running_var], then final [W_out(in,2), b_out(1,2)].
    Returns per hidden layer (W' bf16, b' f32), then (W_out^T (2,in) f32,
    b_out (1,2) f32) for the VPU/XLU final layer.
    """
    folded = []
    i = 0
    for _ in range(num_hidden_layers):
        w, b, gamma, beta, mean, var = raw_params[i:i + 6]
        i += 6
        scale = gamma * lax.rsqrt(var + BN_EPS)                     # (1, out)
        folded.append((w * scale).astype(jnp.bfloat16))             # W' = W * scale
        folded.append(((b - mean) * scale + beta).astype(jnp.float32))
    w_out, b_out = raw_params[i], raw_params[i + 1]
    folded.append(jnp.asarray(w_out.T, jnp.float32))                # (2, dim)
    folded.append(jnp.asarray(b_out, jnp.float32))                  # (1, 2)
    return folded


def _round_up(n, m):
    return ((n + m - 1) // m) * m


def _choose_batch_tile(batch, block_rows=1024, min_rows=128, target_steps=8):
    """Megacore-aware batch tile.

    Guarantees >=2 grid steps as soon as the batch can be split into 8-row
    (one-sublane) tiles (so both v7x TensorCores get work), aims for
    ~target_steps steps for large batches (intra-core DMA/compute overlap),
    and caps the tile at block_rows to bound VMEM while amortizing the
    ~0.35us fixed per-step overhead.
    """
    if batch <= 8:
        return batch
    if batch <= min_rows:
        return _round_up(pl.cdiv(batch, 2), 8)
    tb = _round_up(pl.cdiv(batch, target_steps), 8)
    return int(min(block_rows, max(tb, min_rows)))


def bidnet_forward(x, params, num_hidden_layers, block_rows=1024):
    """x: (B, input_dim) f32; params: BN-folded flat list from fold_bn_params."""
    batch, in_dim = x.shape
    if x.dtype != jnp.float32:
        x = x.astype(jnp.float32)   # mirrors PyTorch .float(); no-op for f32 inputs

    tb = _choose_batch_tile(batch, block_rows)
    grid = (pl.cdiv(batch, tb),)

    x_spec = pl.BlockSpec((tb, in_dim), lambda i: (i, 0))
    out_spec = pl.BlockSpec((tb, 2), lambda i: (i, 0))
    # Weights/biases: whole-array blocks with a constant index_map, so they are
    # DMA'd once and stay VMEM-resident across all batch tiles.
    param_specs = [pl.BlockSpec(p.shape, lambda i: (0, 0)) for p in params]

    return pl.pallas_call(
        _make_kernel(num_hidden_layers),
        out_shape=jax.ShapeDtypeStruct((batch, 2), jnp.float32),
        grid=grid,
        in_specs=[x_spec] + param_specs,
        out_specs=out_spec,
        compiler_params=pltpu.CompilerParams(
            dimension_semantics=("parallel",),      # megacore sharding on v7x
            vmem_limit_bytes=8 * 1024 * 1024,       # footprint ~2 MiB; v7x-safe
        ),
    )(x, *params)


def init_bidnet_params(key, input_dim, hidden_dim):
    """Deterministic synthetic parameters mirroring BidNet.__init__ shapes (f32)."""
    params = []
    dim = input_dim
    for out_d in hidden_dim:
        key, kw, kg, kb, km, kv = jax.random.split(key, 6)
        # xavier_uniform_ on weight (out_d, dim); stored transposed (dim, out_d)
        limit = jnp.sqrt(6.0 / (dim + out_d))
        w = jax.random.uniform(kw, (dim, out_d), jnp.float32, -limit, limit)
        b = jnp.zeros((1, out_d), jnp.float32)                    # zeros_ init
        gamma = 1.0 + 0.1 * jax.random.normal(kg, (1, out_d), jnp.float32)
        beta = 0.1 * jax.random.normal(kb, (1, out_d), jnp.float32)
        mean = 0.1 * jax.random.normal(km, (1, out_d), jnp.float32)
        var = jax.random.uniform(kv, (1, out_d), jnp.float32, 0.5, 1.5)
        params += [w, b, gamma, beta, mean, var]
        dim = out_d
    # final Linear(dim, 2): default PyTorch uniform(-1/sqrt(dim), 1/sqrt(dim))
    key, kw, kb = jax.random.split(key, 3)
    limit = 1.0 / jnp.sqrt(float(dim))
    w_out = jax.random.uniform(kw, (dim, 2), jnp.float32, -limit, limit)
    b_out = jax.random.uniform(kb, (1, 2), jnp.float32, -limit, limit)
    params += [w_out, b_out]
    return params


def reference_forward(x, raw_params, num_hidden_layers):
    """Pure-JAX f32 reference (eval-mode PyTorch semantics) for correctness."""
    h = x.astype(jnp.float32)
    i = 0
    for _ in range(num_hidden_layers):
        w, b, g, be, m, v = raw_params[i:i + 6]
        i += 6
        h = h @ w + b
        h = (h - m) * lax.rsqrt(v + BN_EPS) * g + be
        h = jnp.where(h > 0, h, LEAKY_SLOPE * h)
    out = h @ raw_params[i] + raw_params[i + 1]
    mu = out[:, 0:1]
    sigma = jnp.maximum(out[:, 1:2], 0.0)
    return jnp.concatenate([mu, sigma], axis=1)


if __name__ == "__main__":
    input_dim = 16
    hidden_dim = [32, 32]
    num_layers = len(hidden_dim)

    key = jax.random.PRNGKey(0)
    key, kp = jax.random.split(key)
    raw_params = init_bidnet_params(kp, input_dim, hidden_dim)
    params = fold_bn_params(raw_params, num_layers)

    fwd = jax.jit(functools.partial(bidnet_forward, num_hidden_layers=num_layers))

    def check(x):
        out = fwd(x, params)
        jax.block_until_ready(out)
        ref = reference_forward(x, raw_params, num_layers)
        assert out.shape == (x.shape[0], 2), out.shape
        # bf16 MXU operands in the hidden layers -> loosened tolerance vs f32 ref.
        assert jnp.allclose(out, ref, atol=5e-2, rtol=5e-2), (out, ref)
        assert jnp.all(out[:, 1] >= 0.0)                 # sigma column is ReLU'd

    # --- small batch: single whole-batch tile ---
    key, kx = jax.random.split(key)
    check(jax.random.normal(kx, (8, input_dim), jnp.float32))

    # --- odd batch: 2-way split with a partial (clipped) last tile ---
    key, kx = jax.random.split(key)
    check(jax.random.normal(kx, (40, input_dim), jnp.float32))

    # --- larger batch: 4 even grid steps (megacore + pipelining) ---
    key, kx = jax.random.split(key)
    check(jax.random.normal(kx, (512, input_dim), jnp.float32))

    print("KERNEL_OK")
</pallas_src>

<mosaic_0001>
module attributes {stable_mosaic.version = 11 : i64} {
  func.func @kernel(%arg0: i32, %arg1: memref<8x16xf32, #tpu.memory_space<vmem>>, %arg2: memref<16x32xbf16, #tpu.memory_space<vmem>>, %arg3: memref<1x32xf32, #tpu.memory_space<vmem>>, %arg4: memref<32x32xbf16, #tpu.memory_space<vmem>>, %arg5: memref<1x32xf32, #tpu.memory_space<vmem>>, %arg6: memref<2x32xf32, #tpu.memory_space<vmem>>, %arg7: memref<1x2xf32, #tpu.memory_space<vmem>>, %arg8: memref<8x2xf32, #tpu.memory_space<vmem>>) attributes {dimension_semantics = [#tpu.dimension_semantics<parallel>], iteration_bounds = array<i64: 1>, scalar_prefetch = 0 : i64, scratch_operands = 0 : i64, tpu.core_type = #tpu.core_type<tc>, window_params = [{transform_indices = @transform_0, window_bounds = array<i64: 8, 16>}, {pipeline_mode = #tpu.pipeline_mode<synchronous>, transform_indices = @transform_1, window_bounds = array<i64: 16, 32>}, {pipeline_mode = #tpu.pipeline_mode<synchronous>, transform_indices = @transform_2, window_bounds = array<i64: 1, 32>}, {pipeline_mode = #tpu.pipeline_mode<synchronous>, transform_indices = @transform_3, window_bounds = array<i64: 32, 32>}, {pipeline_mode = #tpu.pipeline_mode<synchronous>, transform_indices = @transform_4, window_bounds = array<i64: 1, 32>}, {pipeline_mode = #tpu.pipeline_mode<synchronous>, transform_indices = @transform_5, window_bounds = array<i64: 2, 32>}, {pipeline_mode = #tpu.pipeline_mode<synchronous>, transform_indices = @transform_6, window_bounds = array<i64: 1, 2>}, {transform_indices = @transform_7, window_bounds = array<i64: 8, 2>}]} {
    %c0 = arith.constant 0 : index
    %c0_0 = arith.constant 0 : index
    %0 = vector.load %arg1[%c0, %c0_0] : memref<8x16xf32, #tpu.memory_space<vmem>>, vector<8x16xf32>
    %c0_1 = arith.constant 0 : index
    %c0_2 = arith.constant 0 : index
    %1 = vector.load %arg2[%c0_1, %c0_2] : memref<16x32xbf16, #tpu.memory_space<vmem>>, vector<16x32xbf16>
    %c0_3 = arith.constant 0 : index
    %c0_4 = arith.constant 0 : index
    %2 = vector.load %arg3[%c0_3, %c0_4] : memref<1x32xf32, #tpu.memory_space<vmem>>, vector<1x32xf32>
    %3 = arith.truncf %0 : vector<8x16xf32> to vector<8x16xbf16>
    %cst = arith.constant dense<0.000000e+00> : vector<8x32xf32>
    %4 = tpu.matmul %3, %1, %cst {dimension_numbers = #tpu.dot_dimension_numbers<[1], [0], [0], [1], [0, 0, 1, 1], [], []>} : vector<8x16xbf16>, vector<16x32xbf16>, vector<8x32xf32> -> vector<8x32xf32>
    %5 = vector.broadcast %2 : vector<1x32xf32> to vector<8x32xf32>
    %6 = arith.addf %4, %5 : vector<8x32xf32>
    %cst_5 = arith.constant 2.000000e-01 : f32
    %7 = vector.broadcast %cst_5 : f32 to vector<8x32xf32>
    %8 = arith.mulf %7, %6 : vector<8x32xf32>
    %9 = arith.maximumf %6, %8 : vector<8x32xf32>
    %c0_6 = arith.constant 0 : index
    %c0_7 = arith.constant 0 : index
    %10 = vector.load %arg4[%c0_6, %c0_7] : memref<32x32xbf16, #tpu.memory_space<vmem>>, vector<32x32xbf16>
    %c0_8 = arith.constant 0 : index
    %c0_9 = arith.constant 0 : index
    %11 = vector.load %arg5[%c0_8, %c0_9] : memref<1x32xf32, #tpu.memory_space<vmem>>, vector<1x32xf32>
    %12 = arith.truncf %9 : vector<8x32xf32> to vector<8x32xbf16>
    %cst_10 = arith.constant dense<0.000000e+00> : vector<8x32xf32>
    %13 = tpu.matmul %12, %10, %cst_10 {dimension_numbers = #tpu.dot_dimension_numbers<[1], [0], [0], [1], [0, 0, 1, 1], [], []>} : vector<8x32xbf16>, vector<32x32xbf16>, vector<8x32xf32> -> vector<8x32xf32>
    %14 = vector.broadcast %11 : vector<1x32xf32> to vector<8x32xf32>
    %15 = arith.addf %13, %14 : vector<8x32xf32>
    %cst_11 = arith.constant 2.000000e-01 : f32
    %16 = vector.broadcast %cst_11 : f32 to vector<8x32xf32>
    %17 = arith.mulf %16, %15 : vector<8x32xf32>
    %18 = arith.maximumf %15, %17 : vector<8x32xf32>
    %c0_12 = arith.constant 0 : index
    %c0_13 = arith.constant 0 : index
    %19 = vector.load %arg6[%c0_12, %c0_13] : memref<2x32xf32, #tpu.memory_space<vmem>>, vector<2x32xf32>
    %c0_14 = arith.constant 0 : index
    %c0_15 = arith.constant 0 : index
    %20 = vector.load %arg7[%c0_14, %c0_15] : memref<1x2xf32, #tpu.memory_space<vmem>>, vector<1x2xf32>
    %21 = vector.extract_strided_slice %19 {offsets = [0, 0], sizes = [1, 32], strides = [1, 1]} : vector<2x32xf32> to vector<1x32xf32>
    %22 = vector.broadcast %21 : vector<1x32xf32> to vector<8x32xf32>
    %23 = arith.mulf %18, %22 : vector<8x32xf32>
    %cst_16 = arith.constant dense<0.000000e+00> : vector<8xf32>
    %24 = vector.multi_reduction <add>, %23, %cst_16 [1] : vector<8x32xf32> to vector<8xf32>
    %25 = vector.shape_cast %24 : vector<8xf32> to vector<8x1xf32>
    %26 = vector.extract_strided_slice %20 {offsets = [0, 0], sizes = [1, 1], strides = [1, 1]} : vector<1x2xf32> to vector<1x1xf32>
    %27 = vector.broadcast %26 : vector<1x1xf32> to vector<8x1xf32>
    %28 = arith.addf %25, %27 : vector<8x1xf32>
    %29 = vector.extract_strided_slice %19 {offsets = [1, 0], sizes = [1, 32], strides = [1, 1]} : vector<2x32xf32> to vector<1x32xf32>
    %30 = vector.broadcast %29 : vector<1x32xf32> to vector<8x32xf32>
    %31 = arith.mulf %18, %30 : vector<8x32xf32>
    %cst_17 = arith.constant dense<0.000000e+00> : vector<8xf32>
    %32 = vector.multi_reduction <add>, %31, %cst_17 [1] : vector<8x32xf32> to vector<8xf32>
    %33 = vector.shape_cast %32 : vector<8xf32> to vector<8x1xf32>
    %34 = vector.extract_strided_slice %20 {offsets = [0, 1], sizes = [1, 1], strides = [1, 1]} : vector<1x2xf32> to vector<1x1xf32>
    %35 = vector.broadcast %34 : vector<1x1xf32> to vector<8x1xf32>
    %36 = arith.addf %33, %35 : vector<8x1xf32>
    %cst_18 = arith.constant 0.000000e+00 : f32
    %37 = vector.broadcast %cst_18 : f32 to vector<8x1xf32>
    %38 = arith.maximumf %36, %37 : vector<8x1xf32>
    %39 = tpu.iota {dimensions = array<i32: 1>} : vector<8x2xi32>
    %c0_i32 = arith.constant 0 : i32
    %40 = vector.broadcast %c0_i32 : i32 to vector<8x2xi32>
    %41 = arith.cmpi eq, %39, %40 : vector<8x2xi32>
    %42 = vector.shape_cast %28 : vector<8x1xf32> to vector<8x1xf32>
    %43 = vector.broadcast %42 : vector<8x1xf32> to vector<8x2xf32>
    %44 = vector.shape_cast %38 : vector<8x1xf32> to vector<8x1xf32>
    %45 = vector.broadcast %44 : vector<8x1xf32> to vector<8x2xf32>
    %46 = arith.select %41, %43, %45 : vector<8x2xi1>, vector<8x2xf32>
    %c0_19 = arith.constant 0 : index
    %c0_20 = arith.constant 0 : index
    %47 = vector.load %arg8[%c0_19, %c0_20] : memref<8x2xf32, #tpu.memory_space<vmem>>, vector<8x2xf32>
    tpu.vector_store %arg8[%c0_19, %c0_20], %46 {strides = array<i32>} : memref<8x2xf32, #tpu.memory_space<vmem>>, vector<8x2xf32>,
    return
  }
  func.func @transform_0(%arg0: i32) -> (i32, i32) {
    %c0_i32 = arith.constant 0 : i32
    %c0_i32_0 = arith.constant 0 : i32
    return %arg0, %c0_i32 : i32, i32
  }
  func.func @transform_1(%arg0: i32) -> (i32, i32) {
    %c0_i32 = arith.constant 0 : i32
    %c0_i32_0 = arith.constant 0 : i32
    %c0_i32_1 = arith.constant 0 : i32
    return %c0_i32, %c0_i32_0 : i32, i32
  }
  func.func @transform_2(%arg0: i32) -> (i32, i32) {
    %c0_i32 = arith.constant 0 : i32
    %c0_i32_0 = arith.constant 0 : i32
    %c0_i32_1 = arith.constant 0 : i32
    return %c0_i32, %c0_i32_0 : i32, i32
  }
  func.func @transform_3(%arg0: i32) -> (i32, i32) {
    %c0_i32 = arith.constant 0 : i32
    %c0_i32_0 = arith.constant 0 : i32
    %c0_i32_1 = arith.constant 0 : i32
    return %c0_i32, %c0_i32_0 : i32, i32
  }
  func.func @transform_4(%arg0: i32) -> (i32, i32) {
    %c0_i32 = arith.constant 0 : i32
    %c0_i32_0 = arith.constant 0 : i32
    %c0_i32_1 = arith.constant 0 : i32
    return %c0_i32, %c0_i32_0 : i32, i32
  }
  func.func @transform_5(%arg0: i32) -> (i32, i32) {
    %c0_i32 = arith.constant 0 : i32
    %c0_i32_0 = arith.constant 0 : i32
    %c0_i32_1 = arith.constant 0 : i32
    return %c0_i32, %c0_i32_0 : i32, i32
  }
  func.func @transform_6(%arg0: i32) -> (i32, i32) {
    %c0_i32 = arith.constant 0 : i32
    %c0_i32_0 = arith.constant 0 : i32
    %c0_i32_1 = arith.constant 0 : i32
    return %c0_i32, %c0_i32_0 : i32, i32
  }
  func.func @transform_7(%arg0: i32) -> (i32, i32) {
    %c0_i32 = arith.constant 0 : i32
    %c0_i32_0 = arith.constant 0 : i32
    return %arg0, %c0_i32 : i32, i32
  }
}

</mosaic_0001>

<bundles_post_ra>
// kernel: bidnet_forward.1
= control target key start
LH: loop header
LB: loop body
LE: loop exit
PB: predicated region body
PF: predicated region fallthrough
CT: control target
= control target key end

     0   :  { %12 = vsyncpa [#allocation3], 0  ;;  %s430_s0 = inlined_call_operand.hbm [shape: f32[8,16], index: 0, kind: input, shape index: {}]   ;;  %s431_s1 = inlined_call_operand.hbm [shape: bf16[16,32], index: 1, kind: input, shape index: {}]   ;;  %s432_s2 = inlined_call_operand.vmem [shape: f32[1,32], index: 2, kind: input, shape index: {}]   ;;  %s433_s3 = inlined_call_operand.hbm [shape: bf16[32,32], index: 3, kind: input, shape index: {}]   ;;  %s434_s4 = inlined_call_operand.vmem [shape: f32[1,32], index: 4, kind: input, shape index: {}]   ;;  %s435_s5 = inlined_call_operand.vmem [shape: f32[2,32], index: 5, kind: input, shape index: {}]   ;;  %s436_s6 = inlined_call_operand.vmem [shape: f32[1,2], index: 6, kind: input, shape index: {}]   ;;  %s437_s7 = inlined_call_operand.vmem [shape: f32[8,2], index: 7, kind: output, shape index: {}]  }
   0x1   :  { %13 = vsyncpa [#allocation5], 0  ;;  %s354_s24 = smov [#allocation4]  }
   0x2   :  { %s29_s25 = sshll.u32 %s354_s24, 4  ;;  %s30_s25 = int_to_ptr.vmem [resolvable:$true] %s29_s25 }
   0x3   :  { %s298_s26 = scalar_lea.vmem %s30_s25, 128  ;;  %p303_p1 = scmp.lt.s32.totalorder %s30_s25, %s30_s25 }
   0x4   :  { %p299_p0 = scmp.ne.s32.totalorder %s30_s25, %s298_s26  ;;  %p304_p2 = scmp.lt.s32.totalorder %s298_s26, %s298_s26 }
   0x6   :  { %p305_p3 = por %p304_p2, %p303_p1 }
   0x8   :  { %p306_p4 = pnand %p305_p3, %p299_p0 }
   0xa   :  { %309 = shalt.err (!%p306_p4)
}
   0xb   :  { %s355_s27 = smov 64   ;;  %s356_s28 = smov 4  }
   0xc   :  { %35 = dma.hbm_to_vmem [thread:$0]  %s431_s1, 128, %s30_s25, [#allocation5], %s355_s27, %s355_s27, %s356_s28  }
   0xd   :  { %s357_s8 = smov [#allocation2]   ;;  %s358_s10 = smov [#allocation6]  }
   0xe   :  { %s20_s9 = sshll.u32 %s357_s8, 4  ;;  %s43_s11 = sshll.u32 %s358_s10, 4  ;;  %s21_s9 = int_to_ptr.vmem [resolvable:$true] %s20_s9  ;;  %s44_s11 = int_to_ptr.vmem [resolvable:$true] %s43_s11 }
   0xf   :  { %s318_s12 = scalar_lea.vmem %s21_s9, 128  ;;  %p323_p6 = scmp.lt.s32.totalorder %s21_s9, %s21_s9 }
  0x10   :  { %p319_p5 = scmp.ne.s32.totalorder %s21_s9, %s318_s12  ;;  %p324_p7 = scmp.lt.s32.totalorder %s318_s12, %s318_s12 }
  0x12   :  { %p325_p8 = por %p324_p7, %p323_p6 }
  0x14   :  { %p326_p9 = pnand %p325_p8, %p319_p5 }
  0x16   :  { %329 = shalt.err (!%p326_p9)
}
  0x17   :  { %23 = dma.hbm_to_vmem [thread:$0]  %s430_s0, 128, %s21_s9, [#allocation3]  }
  0x18   :  { %s338_s15 = scalar_lea.vmem %s44_s11, 256  ;;  %p343_p11 = scmp.lt.s32.totalorder %s44_s11, %s44_s11 }
  0x19   :  { %p339_p10 = scmp.ne.s32.totalorder %s44_s11, %s338_s15  ;;  %p344_p12 = scmp.lt.s32.totalorder %s338_s15, %s338_s15 }
  0x1b   :  { %p345_p13 = por %p344_p12, %p343_p11 }
  0x1d   :  { %p346_p0 = pnand %p345_p13, %p339_p10 }
  0x1f   :  { %349 = shalt.err (!%p346_p0)
}
  0x20   :  { %49 = dma.hbm_to_vmem [thread:$0]  %s433_s3, 256, %s44_s11, [#allocation5], %s355_s27, %s355_s27, %s356_s28  }
  0x21   :  { %350 = dma.done.wait [#allocation3], 128  }
  0x22   :  { %351 = vsyncadd [#allocation3], 4294967168 }
  0x23   :  { %352 = dma.done.wait [#allocation5], 384  }
  0x24   :  { %353 = vsyncadd [#allocation5], 4294966912  ;;  %v359_v0 = vmov 0.0   ;;  %vm360_vm0 = vmmov 0   ;;  %v287_v1 = vld [vmem:[#allocation4] sm:$0xff]   ;;  %v66_v2 = vld [vmem:[#allocation2] sm:$0xff]  ;;  %v201_v15 = vlaneseq }
  0x25   :  { %261 = vmatprep.subr.bf16.mxu0 %v359_v0  ;;  %263 = vmatprep.mubr.msk.bf16.mxu0 %vm360_vm0, %v359_v0  ;;  %vm83_vm1 = vcmask 130048   ;;  %v70_v3 = vpack.c.bf16 %v66_v2, %v66_v2  ;;  %v288_v4 = vld [vmem:[#allocation6 + $0x8] sm:$0xff]   ;;  %v289_v5 = vld [vmem:[#allocation6] sm:$0xff]   ;;  %v248_v6 = vld [vmem:[%s432_s2] ss:$0 sm:$0xff]  ;;  %vm153_vm2 = vcmask 261120  }
  0x26   :  { %267 = vmatprep.subr.bf16.mxu1 %v359_v0  ;;  %271 = vmatprep.mubr.msk.bf16.mxu1 %vm360_vm0, %v359_v0  ;;  %v202_v16 = vshrl.u32 %v201_v15, 7  ;;  %v251_v17 = vld [vmem:[%s434_s4] ss:$0 sm:$0xff]  ;;  %v361_v34 = vmov 0   ;;  %v362_v35 = vmov 1   ;;  %v227_v42 = vand.u32 127, %v201_v15 }
  0x27   :  { %262 = vmatpush3.bf16.msra.mxu0 %v287_v1  ;;  %268 = vmatpush3.bf16.msra.mxu1 %v288_v4  ;;  %v199_v20 = vld [vmem:[%s435_s5] sm:$0x3]  ;;  %vm240_vm4 = vcmask 15360  }
  0x28   :  { %269 = vmatprep.subr.bf16.mxu1 %v359_v0  ;;  %v218_v18 = vsub.s32 1, %v202_v16  ;;  %v203_v22 = vsub.s32 0, %v202_v16  ;;  %284 = vset.pattern.permute.xlu1 %v361_v34  ;;  %v255_v37 = vld [vmem:[%s436_s6] ss:$0 sm:$0xff]  ;;  %vm228_vm3 = vcmp.eq.s32.totalorder %v227_v42, 0 }
  0x29   :  { %286 = vset.pattern.permute.xlu0 %v362_v35 }
  0x2a   :  { %264 = vmatmul.mubr.msk.bf16.vlgmr.msra.gmra.mxu0 %vm83_vm1, %v70_v3  ;;  %v219_v25 = vrot.slane %v199_v20, %v218_v18  ;;  %v204_v28 = vrot.slane %v199_v20, %v203_v22 }
  0x2b   :  { %270 = vmatpush3.bf16.msra.mxu1 %v289_v5 }
  0xea   :  { %v121_v7 = vpop.f32.mrf.mxu0 }
  0xeb   :  { %v122_v8 = vadd.f32 %v248_v6, %v121_v7 }
  0xec   :  { %v265_v9 = vpop.f32.mrf.mxu0 }
  0xed   :  { %v127_v10 = vmul.f32 0.2, %v122_v8 }
  0xee   :  { %v124_v11 = vpop.f32.mrf.mxu0 }
  0xef   :  { %v128_v12 = vmax.f32 %v122_v8, %v127_v10 }
  0xf0   :  { %v266_v13 = vpop.f32.mrf.mxu0 }
  0xf1   :  { %v134_v14 = vpack.c.bf16 %v128_v12, %v128_v12 }
  0xf3   :  { %272 = vmatmul.mubr.msk.bf16.vlgmr.msra.gmra.mxu1 %vm153_vm2, %v134_v14 }
 0x1b3   :  { %v191_v19 = vpop.f32.mrf.mxu1 }
 0x1b4   :  { %v192_v21 = vadd.f32 %v251_v17, %v191_v19 }
 0x1b5   :  { %v273_v23 = vpop.f32.mrf.mxu1 }
 0x1b6   :  { %v197_v24 = vmul.f32 0.2, %v192_v21 }
 0x1b7   :  { %v194_v26 = vpop.f32.mrf.mxu1 }
 0x1b8   :  { %v198_v27 = vmax.f32 %v192_v21, %v197_v24 }
 0x1b9   :  { %v274_v29 = vpop.f32.mrf.mxu1 }
 0x1ba   :  { %v220_v30 = vmul.f32 %v219_v25, %v198_v27  ;;  %v205_v32 = vmul.f32 %v204_v28, %v198_v27 }
 0x1bc   :  { %v221_v31 = vsel %vm153_vm2, %v220_v30, 0.0  ;;  %v206_v33 = vsel %vm153_vm2, %v205_v32, 0.0 }
 0x1bd   :  { %222 = vadd.xlane.f32.xlu0 %v221_v31 }
 0x1c1   :  { %207 = vadd.xlane.f32.xlu0 %v206_v33 }
 0x246   :  { %v223_v36 = vpop.xlane.xlu0 %222 }
 0x247   :  { %v224_v40 = vadd.f32 %v255_v37, %v223_v36 }
 0x249   :  { %v225_v41 = vmax.f32 %v224_v40, 0.0 }
 0x24a   :  { %v208_v38 = vpop.xlane.xlu0 %207 }
 0x24b   :  { %v215_v39 = vadd.f32 %v255_v37, %v208_v38 }
 0x24d   :  { %231 = vperm.xlu1 %284, %v215_v39  }
 0x251   :  { %285 = vset.pattern.permute.xlu1 %v362_v35 }
 0x252   :  { %236 = vperm.xlu1 %285, %v225_v41  }
 0x2c8   :  { %v232_v43 = vpop.permute.xlu1 %231 }
 0x2cd   :  { %v237_v44 = vpop.permute.xlu1 %236 }
 0x2ce   :  { %v239_v45 = vsel %vm228_vm3, %v232_v43, %v237_v44 }
 0x2cf   :  { %241 = vst.msk [vmem:[%s437_s7] sm:$0xff] %vm240_vm4, %v239_v45 }
 0x2d0   :  { %246 = vsyncpa [#allocation3], 1 }
 0x2d1   :  { %247 = vsyncpa [#allocation5], 1 }

</bundles_post_ra>
